<compile_context>
chip_gen: v7x
topology: tpu7x:2x2x1
jax: 0.10.0
libtpu: 0.0.40
codegen_flags: <defaults>
</compile_context>

<pallas_src>
import jax
import jax.numpy as jnp
from jax.experimental import pallas as pl
from jax.experimental.pallas import tpu as pltpu


def _round_up(a: int, b: int) -> int:
    return -(-a // b) * b


def _cdiv(a: int, b: int) -> int:
    return -(-a // b)


def _linear_kernel(x_ref, w_ref, b_ref, o_ref):
    """One (tm, tn) tile of y = x @ w + b, reducing over grid axis 2.

    x_ref: (tm, tk)  activations
    w_ref: (tk, tn)  weight already in (E, C) layout -> canonical (M,K)x(K,N)
    b_ref: (1, tn)   bias row for this N tile (f32)
    o_ref: (tm, tn)  f32 output tile; k-invariant index_map + k innermost
                     => VMEM-resident accumulator, no scratch needed
    """
    k = pl.program_id(2)

    @pl.when(k == 0)
    def _():
        o_ref[...] = jnp.zeros_like(o_ref)

    o_ref[...] += jnp.dot(
        x_ref[...], w_ref[...], preferred_element_type=jnp.float32
    )

    @pl.when(k == pl.num_programs(2) - 1)
    def _():
        # Bias added exactly once, folded into the finalize (VPU filler).
        o_ref[...] += b_ref[...]


class Classifier:
    """Pallas-TPU equivalent of the PyTorch `Classifier` (single nn.Linear)."""

    TM_CAP = 512    # batch-tile cap          (f32: ~2 MiB/buffer at tk=1024)
    TN_CAP = 512    # class-tile cap
    TK_CAP = 1024   # embedding (reduction) tile cap
    # Double-buffered worst case: x 4 MiB + w 4 MiB + out 2 MiB ~= 10 MiB,
    # inside every generation's scoped-VMEM default (v5e 16 / v6e 32 / v7x 32 MiB).

    def __init__(self, embedding_size, num_classes, *, key,
                 stream_dtype=None):
        self.E = int(embedding_size)
        self.C = int(num_classes)
        # jnp.bfloat16 here halves the weight/activation HBM streams; logits
        # stay f32 (accumulation is always f32 on the MXU).
        self.stream_dtype = stream_dtype

        # --- parameter init (matches nn.Linear's uniform(-1/sqrt(E), 1/sqrt(E))) ---
        kw, kb = jax.random.split(key)
        bound = 1.0 / (self.E ** 0.5)
        self.weight = jax.random.uniform(
            kw, (self.C, self.E), dtype=jnp.float32, minval=-bound, maxval=bound)
        self.bias = jax.random.uniform(
            kb, (self.C,), dtype=jnp.float32, minval=-bound, maxval=bound)

        # --- one-time weight prep (amortized over all forward calls) ---
        self.tn = self._balanced_tile(self.C, self.TN_CAP, 128)
        self.tk, self.E_pad = self._choose_tk(self.E, self.TK_CAP)
        self.C_pad = _round_up(self.C, self.tn)

        w_t = self.weight.T                     # (E, C): canonical K-major RHS
        if (self.E_pad, self.C_pad) != (self.E, self.C):
            w_t = jnp.pad(w_t, ((0, self.E_pad - self.E),
                                (0, self.C_pad - self.C)))
        if self.stream_dtype is not None:
            w_t = w_t.astype(self.stream_dtype)
        self.w_t = w_t

        b2d = self.bias
        if self.C_pad != self.C:
            b2d = jnp.pad(b2d, (0, self.C_pad - self.C))
        self.b2d = b2d.reshape(1, self.C_pad).astype(jnp.float32)

    # -- tile selection helpers -------------------------------------------------
    @staticmethod
    def _balanced_tile(dim, cap, align):
        """Largest-but-balanced tile; single full-extent block if dim <= cap."""
        if dim <= cap:
            return dim                                  # full dim: legal, no padding
        return _round_up(_cdiv(dim, _cdiv(dim, cap)), align)

    @staticmethod
    def _choose_tk(E, cap):
        """Reduction tile: prefer a 128-multiple divisor of E (no K padding)."""
        if E <= cap:
            return E, E
        for cand in range(cap - cap % 128, 127, -128):
            if E % cand == 0:
                return cand, E
        n = _cdiv(E, cap)
        tk = _round_up(_cdiv(E, n), 128)
        return tk, _round_up(E, tk)

    # -- forward ----------------------------------------------------------------
    def __call__(self, x):
        B, E = x.shape
        assert E == self.E, "x must be (batch, embedding_size)"

        sublane = 16 if self.stream_dtype == jnp.bfloat16 else 8
        tm = self._balanced_tile(B, self.TM_CAP, sublane)
        B_pad = _round_up(B, tm)

        x_p = x if self.stream_dtype is None else x.astype(self.stream_dtype)
        if (B_pad, self.E_pad) != (B, E):
            x_p = jnp.pad(x_p, ((0, B_pad - B), (0, self.E_pad - E)))

        tn, tk = self.tn, self.tk
        grid = (B_pad // tm, self.C_pad // tn, self.E_pad // tk)

        itemsize_x = jnp.dtype(x_p.dtype).itemsize
        itemsize_w = jnp.dtype(self.w_t.dtype).itemsize
        cost = pl.CostEstimate(
            flops=2 * B_pad * self.C_pad * self.E_pad,
            transcendentals=0,
            bytes_accessed=(itemsize_x * B_pad * self.E_pad * grid[1]
                            + itemsize_w * self.E_pad * self.C_pad * grid[0]
                            + 4 * B_pad * self.C_pad),
        )

        out = pl.pallas_call(
            _linear_kernel,
            out_shape=jax.ShapeDtypeStruct((B_pad, self.C_pad), jnp.float32),
            grid_spec=pltpu.PrefetchScalarGridSpec(
                num_scalar_prefetch=0,
                grid=grid,
                in_specs=[
                    pl.BlockSpec((tm, tk), lambda i, j, k: (i, k)),   # x tile
                    pl.BlockSpec((tk, tn), lambda i, j, k: (k, j)),   # w (E,C) tile
                    pl.BlockSpec((1, tn), lambda i, j, k: (0, j)),    # bias tile
                ],
                out_specs=pl.BlockSpec((tm, tn), lambda i, j, k: (i, j)),
            ),
            compiler_params=pltpu.CompilerParams(
                dimension_semantics=("parallel", "parallel", "arbitrary"),
            ),
            cost_estimate=cost,
        )(x_p, self.w_t, self.b2d)

        if (B_pad, self.C_pad) != (B, self.C):
            out = out[:B, :self.C]
        return out


if __name__ == "__main__":
    # Small shapes consistent with the module's forward: x is (batch, embedding_size).
    batch = 2
    embedding_size = 32
    num_classes = 8

    key = jax.random.PRNGKey(0)
    k_params, k_x = jax.random.split(key)

    model = Classifier(embedding_size, num_classes, key=k_params)
    x = jax.random.normal(k_x, (batch, embedding_size), dtype=jnp.float32)

    y = model(x)
    jax.block_until_ready(y)

    # Cross-check against plain JAX reference of nn.Linear: x @ W.T + b.
    y_ref = x @ model.weight.T + model.bias
    assert y.shape == (batch, num_classes)
    assert jnp.allclose(y, y_ref, atol=1e-5, rtol=1e-5)

    print("KERNEL_OK")
</pallas_src>

<mosaic_0001>
module attributes {stable_mosaic.version = 11 : i64} {
  func.func @_linear_kernel(%arg0: i32, %arg1: i32, %arg2: i32, %arg3: memref<2x32xf32, #tpu.memory_space<vmem>>, %arg4: memref<32x8xf32, #tpu.memory_space<vmem>>, %arg5: memref<1x8xf32, #tpu.memory_space<vmem>>, %arg6: memref<2x8xf32, #tpu.memory_space<vmem>>) attributes {dimension_semantics = [#tpu.dimension_semantics<parallel>, #tpu.dimension_semantics<parallel>, #tpu.dimension_semantics<arbitrary>], iteration_bounds = array<i64: 1, 1, 1>, scalar_prefetch = 0 : i64, scratch_operands = 0 : i64, tpu.core_type = #tpu.core_type<tc>, window_params = [{transform_indices = @transform_0, window_bounds = array<i64: 2, 32>}, {transform_indices = @transform_1, window_bounds = array<i64: 32, 8>}, {transform_indices = @transform_2, window_bounds = array<i64: 1, 8>}, {transform_indices = @transform_3, window_bounds = array<i64: 2, 8>}]} {
    %c0_i32 = arith.constant 0 : i32
    %0 = arith.cmpi eq, %arg2, %c0_i32 : i32
    %1 = arith.extui %0 : i1 to i32
    %c0_i32_0 = arith.constant 0 : i32
    %2 = arith.cmpi ne, %1, %c0_i32_0 : i32
    scf.if %2 {
      %cst_10 = arith.constant 0.000000e+00 : f32
      %12 = vector.broadcast %cst_10 : f32 to vector<2x8xf32>
      %c0_11 = arith.constant 0 : index
      %c0_12 = arith.constant 0 : index
      %13 = vector.load %arg6[%c0_11, %c0_12] : memref<2x8xf32, #tpu.memory_space<vmem>>, vector<2x8xf32>
      tpu.vector_store %arg6[%c0_11, %c0_12], %12 {strides = array<i32>} : memref<2x8xf32, #tpu.memory_space<vmem>>, vector<2x8xf32>,
    } else {
    }
    %c0 = arith.constant 0 : index
    %c0_1 = arith.constant 0 : index
    %3 = vector.load %arg6[%c0, %c0_1] : memref<2x8xf32, #tpu.memory_space<vmem>>, vector<2x8xf32>
    %c0_2 = arith.constant 0 : index
    %c0_3 = arith.constant 0 : index
    %4 = vector.load %arg3[%c0_2, %c0_3] : memref<2x32xf32, #tpu.memory_space<vmem>>, vector<2x32xf32>
    %c0_4 = arith.constant 0 : index
    %c0_5 = arith.constant 0 : index
    %5 = vector.load %arg4[%c0_4, %c0_5] : memref<32x8xf32, #tpu.memory_space<vmem>>, vector<32x8xf32>
    %cst = arith.constant dense<0.000000e+00> : vector<2x8xf32>
    %6 = tpu.matmul %4, %5, %cst {dimension_numbers = #tpu.dot_dimension_numbers<[1], [0], [0], [1], [0, 0, 1, 1], [], []>} : vector<2x32xf32>, vector<32x8xf32>, vector<2x8xf32> -> vector<2x8xf32>
    %7 = arith.addf %3, %6 : vector<2x8xf32>
    %c0_6 = arith.constant 0 : index
    %c0_7 = arith.constant 0 : index
    %8 = vector.load %arg6[%c0_6, %c0_7] : memref<2x8xf32, #tpu.memory_space<vmem>>, vector<2x8xf32>
    tpu.vector_store %arg6[%c0_6, %c0_7], %7 {strides = array<i32>} : memref<2x8xf32, #tpu.memory_space<vmem>>, vector<2x8xf32>,
    %c0_i32_8 = arith.constant 0 : i32
    %9 = arith.cmpi eq, %arg2, %c0_i32_8 : i32
    %10 = arith.extui %9 : i1 to i32
    %c0_i32_9 = arith.constant 0 : i32
    %11 = arith.cmpi ne, %10, %c0_i32_9 : i32
    scf.if %11 {
      %c0_10 = arith.constant 0 : index
      %c0_11 = arith.constant 0 : index
      %12 = vector.load %arg6[%c0_10, %c0_11] : memref<2x8xf32, #tpu.memory_space<vmem>>, vector<2x8xf32>
      %c0_12 = arith.constant 0 : index
      %c0_13 = arith.constant 0 : index
      %13 = vector.load %arg5[%c0_12, %c0_13] : memref<1x8xf32, #tpu.memory_space<vmem>>, vector<1x8xf32>
      %14 = vector.broadcast %13 : vector<1x8xf32> to vector<2x8xf32>
      %15 = arith.addf %12, %14 : vector<2x8xf32>
      %c0_14 = arith.constant 0 : index
      %c0_15 = arith.constant 0 : index
      %16 = vector.load %arg6[%c0_14, %c0_15] : memref<2x8xf32, #tpu.memory_space<vmem>>, vector<2x8xf32>
      tpu.vector_store %arg6[%c0_14, %c0_15], %15 {strides = array<i32>} : memref<2x8xf32, #tpu.memory_space<vmem>>, vector<2x8xf32>,
    } else {
    }
    return
  }
  func.func @transform_0(%arg0: i32, %arg1: i32, %arg2: i32) -> (i32, i32) {
    %c0_i32 = arith.constant 0 : i32
    return %arg0, %arg2 : i32, i32
  }
  func.func @transform_1(%arg0: i32, %arg1: i32, %arg2: i32) -> (i32, i32) {
    %c0_i32 = arith.constant 0 : i32
    return %arg2, %arg1 : i32, i32
  }
  func.func @transform_2(%arg0: i32, %arg1: i32, %arg2: i32) -> (i32, i32) {
    %c0_i32 = arith.constant 0 : i32
    %c0_i32_0 = arith.constant 0 : i32
    return %c0_i32, %arg1 : i32, i32
  }
  func.func @transform_3(%arg0: i32, %arg1: i32, %arg2: i32) -> (i32, i32) {
    %c0_i32 = arith.constant 0 : i32
    return %arg0, %arg1 : i32, i32
  }
}

</mosaic_0001>

<bundles_post_ra>
// kernel: tpu_custom_call.1
= control target key start
LH: loop header
LB: loop body
LE: loop exit
PB: predicated region body
PF: predicated region fallthrough
CT: control target
= control target key end

     0   :  { %vm19_vm0 = vcmask 58368   ;;  %v183_v3 = vmov 0.0|0.0   ;;  %v184_v6 = vmov 0.0   ;;  %vm185_vm1 = vmmov 0   ;;  %s240_s0 = inlined_call_operand.vmem [shape: f32[2,32], index: 0, kind: input, shape index: {}]   ;;  %s241_s1 = inlined_call_operand.vmem [shape: f32[32,8], index: 1, kind: input, shape index: {}]   ;;  %s242_s2 = inlined_call_operand.vmem [shape: f32[1,8], index: 2, kind: input, shape index: {}]   ;;  %s243_s3 = inlined_call_operand.hbm [shape: f32[2,8], index: 3, kind: output, shape index: {}]  }
   0x1   :  { %v23_v0 = vld [vmem:[%s241_s1] sm:$0xff]  ;;  %v24_v1 = vld [vmem:[%s241_s1 + $0x8] sm:$0xff]  ;;  %v25_v2 = vld [vmem:[%s241_s1 + $0x10] sm:$0xff]  ;;  %149 = vmatprep.subr.bf16.mxu0 %v183_v3  ;;  %20 = vst.msk [vmem:[#allocation2] sm:$0x3] %vm19_vm0, %v184_v6  ;;  %146 = vmatprep.mubr.msk.f32.mxu0 %vm185_vm1, %v184_v6 }
   0x2   :  { %v150_v4 = vpack.c.bf16 %v24_v1, %v23_v0  ;;  %v26_v5 = vld [vmem:[%s241_s1 + $0x18] sm:$0xff] }
   0x3   :  { %8 = vsyncpa [#allocation3], 0  ;;  %v153_v7 = vpack.c.bf16 %v26_v5, %v25_v2  ;;  %v22_v8 = vld [vmem:[%s240_s0] sm:$0x3]  ;;  %vm27_vm2 = vcmask 261120   ;;  %s186_s23 = smov [#allocation2]  }
   0x4   :  { %151 = vmatpush3.bf16.msra.mxu0 %v150_v4  ;;  %v132_v13 = vld [vmem:[%s242_s2] ss:$0 sm:$0xff]  ;;  %s123_s24 = sshll.u32 %s186_s23, 4  ;;  %s124_s24 = int_to_ptr.vmem [resolvable:$true] %s123_s24 }
   0x5   :  { %152 = vmatprep.subr.bf16.mxu0 %v183_v3  ;;  %s159_s0 = scalar_lea.vmem %s124_s24, 32  ;;  %p164_p1 = scmp.lt.s32.totalorder %s124_s24, %s124_s24 }
   0x6   :  { %p160_p0 = scmp.ne.s32.totalorder %s124_s24, %s159_s0  ;;  %p165_p2 = scmp.lt.s32.totalorder %s159_s0, %s159_s0 }
   0x8   :  { %154 = vmatpush3.bf16.msra.mxu0 %v153_v7  ;;  %v21_v9 = vld [vmem:[#allocation2] sm:$0x3]  ;;  %p166_p3 = por %p165_p2, %p164_p1 }
   0xa   :  { %p167_p4 = pnand %p166_p3, %p160_p0 }
   0xb   :  { %147 = vmatmul.mubr.msk.f32.vlgmr.msra.gmra.mrb[0].mxu0 %vm27_vm2, %v22_v8 }
  0xde   :  { %v97_v10 = vpop.f32.mrb[0].mxu0 }
  0xdf   :  { %v101_v11 = vadd.f32 %v97_v10, %v21_v9  ;;  %v148_v12 = vpop.f32.mrb[1].mxu0 }
  0xe1   :  { %103 = vst.msk [vmem:[#allocation2] sm:$0x3] %vm19_vm0, %v101_v11 }
  0xe8   :  { %v107_v14 = vld [vmem:[#allocation2] sm:$0x3] }
  0xe9   :  { %v115_v15 = vadd.f32 %v132_v13, %v107_v14 }
  0xeb   :  { %116 = vst.msk [vmem:[#allocation2] sm:$0x3] %vm19_vm0, %v115_v15 }
  0xec   :  { %170 = shalt.err (!%p167_p4)
}
  0xed   :  { %s171_s27 = scalar_lea.hbm %s243_s3, 32 }
  0xee   :  { %p172_p5 = scmp.ne.s32.totalorder %s243_s3, %s171_s27  ;;  %p175_p6 = scmp.lt.u32.totalorder %s171_s27, %s243_s3 }
  0xf0   :  { %p177_p7 = pnand %p175_p6, %p172_p5 }
  0xf2   :  { %180 = shalt.err (!%p177_p7)
}
  0xf3   :  { %126 = dma.vmem_to_hbm [thread:$0]  %s124_s24, 32, %s243_s3, [#allocation3]  }
  0xf4   :  { %181 = dma.done.wait [#allocation3], 32  }
  0xf5   :  { %182 = vsyncadd [#allocation3], 4294967264 }
  0xf6   :  { %130 = vsyncpa [#allocation3], 1 }

</bundles_post_ra>
